<compile_context>
chip_gen: v5e
topology: v5e:2x2
jax: 0.10.0
libtpu: 0.0.40
codegen_flags: <defaults>
</compile_context>

<pallas_src>
import math
from functools import partial

import jax
import jax.numpy as jnp
from jax import lax
from jax.experimental import pallas as pl
from jax.experimental.pallas import tpu as pltpu


# ---------------------------------------------------------------------------
# helpers
# ---------------------------------------------------------------------------
def get_capacity(num_tokens, num_experts, *, k=2, capacity_factor=1.25, min_capacity=4):
    capacity = math.floor(k * capacity_factor * num_tokens / num_experts)
    capacity += capacity % 2
    capacity = max(capacity, min_capacity)
    assert capacity > 0
    return capacity


def _vmem_limit_bytes():
    """~75% of physical VMEM (~48 MiB on v7x, ~96 MiB on v5e/v6e)."""
    try:
        cap = int(getattr(pltpu.get_tpu_info(), "vmem_capacity_bytes", 0))
    except Exception:
        cap = 0
    if cap <= 0:
        cap = 64 << 20  # conservative default (v7x-sized)
    return int(min(cap * 3 // 4, 96 << 20))


def _cumsum_block():
    """Token block for the triangular-matmul cumsum: 128 on v5e, 256 on v6e/v7x."""
    try:
        name = str(getattr(pltpu.get_tpu_info(), "chip_version", "")).lower()
        return 128 if "5" in name else 256
    except Exception:
        return 256


def _pick_dispatch_block(s, e, c, vmem_limit):
    """Phase-2 token block, bounded by VMEM (double-buffered f32+int8 output
    blocks plus a handful of wide temporaries), capped at 512 rows."""
    e8 = -(-e // 8) * 8
    c128 = -(-c // 128) * 128
    per_row = 24 * e8 * c128                    # ~VMEM bytes per token row
    budget = max(vmem_limit // 2, 4 << 20)
    cap_rows = max(budget // per_row, 8)
    blk = 8
    while blk * 2 <= min(512, cap_rows):
        blk *= 2
    return min(blk, s)


# ---------------------------------------------------------------------------
# phase 1: routing (sequential grid over token blocks, carried cumsum)
# ---------------------------------------------------------------------------
def _routing_kernel(x_ref, idx_ref, wgt_ref, tot1_ref, aux_ref,
                    counts_ref, tri_ref, *, s, t_blk):
    pid = pl.program_id(0)
    e = x_ref.shape[-1]

    @pl.when(pid == 0)
    def _init():
        counts_ref[...] = jnp.zeros_like(counts_ref)
        aux_ref[...] = jnp.zeros_like(aux_ref)
        r = lax.broadcasted_iota(jnp.int32, (t_blk, t_blk), 0)
        cc = lax.broadcasted_iota(jnp.int32, (t_blk, t_blk), 1)
        tri_ref[...] = (cc <= r).astype(jnp.bfloat16)   # lower-triangular, cached

    x = x_ref[...]                                            # [t_blk, E] f32
    # --- softmax over experts ---
    z = x - jnp.max(x, axis=-1, keepdims=True)
    ez = jnp.exp(z)
    probs = ez / jnp.sum(ez, axis=-1, keepdims=True)

    col = lax.broadcasted_iota(jnp.int32, (t_blk, e), 1)
    # --- top-1 (first-max tie-break == torch.argmax) ---
    max1 = jnp.max(probs, axis=-1, keepdims=True)
    top1 = jnp.min(jnp.where(probs == max1, col, e), axis=-1, keepdims=True)
    mask1 = (col == top1).astype(jnp.float32)
    # --- top-2 on probs with the top-1 entry masked to -inf ---
    probs_ex1 = jnp.where(mask1 > 0.0, -jnp.inf, probs)
    max2 = jnp.max(probs_ex1, axis=-1, keepdims=True)
    top2 = jnp.min(jnp.where(probs_ex1 == max2, col, e), axis=-1, keepdims=True)
    mask2 = (col == top2).astype(jnp.float32)

    if s % t_blk != 0:                       # static: tail-block row masking
        row = pid * t_blk + lax.broadcasted_iota(jnp.int32, (t_blk, 1), 0)
        valid = row < s
        probs_v = jnp.where(valid, probs, 0.0)
        mask1 = jnp.where(valid, mask1, 0.0)
        mask2 = jnp.where(valid, mask2, 0.0)
    else:
        probs_v = probs

    # --- aux-loss partial sums (finalized in the wrapper) ---
    aux_ref[0:1, :] = aux_ref[0:1, :] + jnp.sum(probs_v, axis=0, keepdims=True)
    aux_ref[1:2, :] = aux_ref[1:2, :] + jnp.sum(mask1 + mask2, axis=0, keepdims=True)

    # --- moe_cumsum: one bf16 triangular matmul per block + carried counts.
    #     bf16 operands are exact (0/1 values); accumulation stays in f32. ---
    masks = jnp.concatenate([mask1, mask2], axis=-1).astype(jnp.bfloat16)  # [t_blk, 2E]
    counts = counts_ref[...]                                               # [1, 2E]
    cum = jnp.dot(tri_ref[...], masks, preferred_element_type=jnp.float32) + counts
    counts_ref[...] = cum[t_blk - 1:t_blk, :]          # new running per-expert totals
    rank1 = cum[:, :e] - 1.0
    rank2 = cum[:, e:] - 1.0                           # total1 offset applied in phase 2
    slot1 = jnp.sum(mask1 * rank1, axis=-1, keepdims=True)
    slot2 = jnp.sum(mask2 * rank2, axis=-1, keepdims=True)

    idx_ref[...] = jnp.concatenate(
        [top1, top2, slot1.astype(jnp.int32), slot2.astype(jnp.int32)], axis=-1)
    wgt_ref[...] = jnp.concatenate([max1, max2], axis=-1)

    @pl.when(pid == pl.num_programs(0) - 1)
    def _finalize():
        # pre-drop per-expert top-1 totals (needed for rank2 in phase 2)
        tot1_ref[...] = cum[t_blk - 1:t_blk, :e].astype(jnp.int32)


# ---------------------------------------------------------------------------
# phase 2: combine-weight / dispatch-mask slabs, one [s_blk, E, C] block/step
# ---------------------------------------------------------------------------
def _dispatch_kernel(tot1_ref, idx_ref, wgt_ref, cb_ref, mask_ref):
    s_blk, e, c = cb_ref.shape
    idx = idx_ref[...]                          # [s_blk, 4] i32
    wgt = wgt_ref[...]                          # [s_blk, 2] f32
    top1 = idx[:, 0:1]
    top2 = idx[:, 1:2]
    slot1 = idx[:, 2:3]
    slot2r = idx[:, 3:4]                        # raw top-2 rank (no total1 offset)
    w1 = wgt[:, 0:1]
    w2 = wgt[:, 1:2]
    tot1 = tot1_ref[...]                        # [1, e] i32

    # narrow [s_blk, e] precomputation (cheap, off the wide path)
    exp_id = lax.broadcasted_iota(jnp.int32, (s_blk, e), 1)
    hit1 = top1 == exp_id
    hit2 = top2 == exp_id
    key1 = jnp.where(hit1, slot1, -1)           # capacity slot for this expert, or -1
    key2 = jnp.where(hit2, slot2r + tot1, -1)   # slot >= C never matches => dropped
    val1 = jnp.where(hit1, w1, 0.0)
    val2 = jnp.where(hit2, w2, 0.0)

    # wide [s_blk, e, c] path: ~7 VPU ops per output element
    cap = lax.broadcasted_iota(jnp.int32, (s_blk, e, c), 2)
    oh1 = cap == key1[:, :, None]
    oh2 = cap == key2[:, :, None]
    cb = jnp.where(oh1, val1[:, :, None], jnp.where(oh2, val2[:, :, None], 0.0))
    cb_ref[...] = cb
    mask_ref[...] = (cb != 0.0).astype(jnp.int8)   # == reference cb_weight.bool()


# ---------------------------------------------------------------------------
# wrapper
# ---------------------------------------------------------------------------
def top2_router(inputs, *, capacity_factor_train=1.25, min_capacity=4):
    """Returns (cb_weight [S,E,C] f32, sec_mask [S,E,C] bool, l_aux scalar f32)."""
    assert inputs.dtype == jnp.float32
    s, e = inputs.shape
    assert e >= 2, "top-2 routing needs at least 2 experts"
    assert s < (1 << 24), "f32 matmul cumsum is exact only for S < 2**24"
    c = get_capacity(s, e, capacity_factor=capacity_factor_train,
                     min_capacity=min_capacity)
    vmem_limit = _vmem_limit_bytes()

    # ---- phase 1: routing ----
    t_blk = min(_cumsum_block(), s)
    nb = pl.cdiv(s, t_blk)
    idx, wgt, total1, aux = pl.pallas_call(
        partial(_routing_kernel, s=s, t_blk=t_blk),
        grid=(nb,),
        out_shape=(
            jax.ShapeDtypeStruct((s, 4), jnp.int32),    # top1, top2, slot1, slot2(raw)
            jax.ShapeDtypeStruct((s, 2), jnp.float32),  # w1, w2
            jax.ShapeDtypeStruct((1, e), jnp.int32),    # pre-drop top-1 totals
            jax.ShapeDtypeStruct((2, e), jnp.float32),  # sum(probs,0), sum(cmask,0)
        ),
        in_specs=[pl.BlockSpec((t_blk, e), lambda i: (i, 0))],
        out_specs=(
            pl.BlockSpec((t_blk, 4), lambda i: (i, 0)),
            pl.BlockSpec((t_blk, 2), lambda i: (i, 0)),
            pl.BlockSpec((1, e), lambda i: (0, 0)),
            pl.BlockSpec((2, e), lambda i: (0, 0)),
        ),
        scratch_shapes=[pltpu.VMEM((1, 2 * e), jnp.float32),     # carried counts
                        pltpu.VMEM((t_blk, t_blk), jnp.bfloat16)],  # cached tri
        compiler_params=pltpu.CompilerParams(
            dimension_semantics=("arbitrary",),      # sequential: carried cumsum
            vmem_limit_bytes=vmem_limit),
    )(inputs)

    # aux (load-balancing) loss: E * sum(mean(probs,0) * mean(cmask,0)) / 2
    l_aux = jnp.float32(e) * jnp.sum(aux[0] * aux[1]) / jnp.float32(2.0 * s * s)

    # ---- phase 2: combine-weight / dispatch-mask slabs in the final layout ----
    s_blk = _pick_dispatch_block(s, e, c, vmem_limit)
    t2 = pl.cdiv(s, s_blk)
    cost = pl.CostEstimate(flops=8 * s * e * c, transcendentals=0,
                           bytes_accessed=s * e * c * 5 + s * 24 + e * 4)
    cb_weight, mask_i8 = pl.pallas_call(
        _dispatch_kernel,
        grid=(t2,),
        out_shape=(jax.ShapeDtypeStruct((s, e, c), jnp.float32),
                   jax.ShapeDtypeStruct((s, e, c), jnp.int8)),
        in_specs=[
            pl.BlockSpec((1, e), lambda i: (0, 0)),       # total1 (broadcast)
            pl.BlockSpec((s_blk, 4), lambda i: (i, 0)),   # idx
            pl.BlockSpec((s_blk, 2), lambda i: (i, 0)),   # wgt
        ],
        out_specs=(
            pl.BlockSpec((s_blk, e, c), lambda i: (i, 0, 0)),
            pl.BlockSpec((s_blk, e, c), lambda i: (i, 0, 0)),
        ),
        compiler_params=pltpu.CompilerParams(
            dimension_semantics=("parallel",),
            vmem_limit_bytes=vmem_limit),
        cost_estimate=cost,
    )(total1, idx, wgt)

    sec_mask = mask_i8.astype(jnp.bool_)
    return cb_weight, sec_mask, l_aux


# ---------------------------------------------------------------------------
# pure-JAX reference (mirrors the PyTorch forward) + self-check
# ---------------------------------------------------------------------------
def _top2_router_ref(inputs, capacity):
    s, e = inputs.shape
    logits = jax.nn.softmax(inputs, axis=-1)
    top1 = jnp.argmax(logits, axis=-1)
    mask1 = jax.nn.one_hot(top1, e, dtype=jnp.int32)
    logits_ex1 = jnp.where(mask1.astype(bool), -jnp.inf, logits)
    top2 = jnp.argmax(logits_ex1, axis=-1)
    mask2 = jax.nn.one_hot(top2, e, dtype=jnp.int32)
    cmask = mask1 + mask2
    me = jnp.mean(logits, axis=0)
    ce = jnp.mean(cmask.astype(jnp.float32), axis=0)
    l_aux = e * jnp.sum(me * ce) / 2.0
    rank1 = jnp.cumsum(mask1, axis=0) - 1
    rank2 = jnp.cumsum(mask2, axis=0) - 1 + jnp.sum(mask1, axis=0, keepdims=True)
    mask1 = mask1 * (rank1 < capacity)
    mask2 = mask2 * (rank2 < capacity)
    r1 = jnp.sum(mask1 * rank1, axis=-1)
    r2 = jnp.sum(mask2 * rank2, axis=-1)
    w1 = mask1 * logits
    w2 = mask2 * logits
    r1sc = jax.nn.one_hot(r1, capacity, dtype=jnp.float32)
    r2sc = jax.nn.one_hot(r2, capacity, dtype=jnp.float32)
    cb = w1[:, :, None] * r1sc[:, None, :] + w2[:, :, None] * r2sc[:, None, :]
    return cb, cb.astype(bool), l_aux


if __name__ == "__main__":
    key = jax.random.PRNGKey(0)
    k1, k2 = jax.random.split(key)

    # small single-block case
    S, E = 16, 4
    x = jax.random.normal(k1, (S, E), dtype=jnp.float32)
    cb, sec, laux = top2_router(x)
    jax.block_until_ready((cb, sec, laux))
    cap = get_capacity(S, E)
    cb_ref, sec_ref, laux_ref = _top2_router_ref(x, cap)
    assert cb.shape == (S, E, cap) and sec.shape == (S, E, cap)
    assert jnp.allclose(cb, cb_ref, atol=1e-5), "combine weights mismatch"
    assert bool(jnp.array_equal(sec, sec_ref)), "dispatch mask mismatch"
    assert jnp.allclose(laux, laux_ref, atol=1e-5), "aux loss mismatch"

    # multi-block case (exercises the carried cumsum + tail-row masking)
    S2, E2 = 384, 8
    x2 = jax.random.normal(k2, (S2, E2), dtype=jnp.float32)
    cb2, sec2, laux2 = top2_router(x2)
    jax.block_until_ready((cb2, sec2, laux2))
    cap2 = get_capacity(S2, E2)
    cb2_ref, sec2_ref, laux2_ref = _top2_router_ref(x2, cap2)
    assert jnp.allclose(cb2, cb2_ref, atol=1e-5), "combine weights mismatch (multi-block)"
    assert bool(jnp.array_equal(sec2, sec2_ref)), "dispatch mask mismatch (multi-block)"
    assert jnp.allclose(laux2, laux2_ref, atol=1e-5), "aux loss mismatch (multi-block)"

    print("KERNEL_OK")
</pallas_src>

<mosaic_0001>
module attributes {stable_mosaic.version = 11 : i64} {
  func.func @_routing_kernel(%arg0: i32, %arg1: memref<16x4xf32, #tpu.memory_space<vmem>>, %arg2: memref<16x4xi32, #tpu.memory_space<vmem>>, %arg3: memref<16x2xf32, #tpu.memory_space<vmem>>, %arg4: memref<1x4xi32, #tpu.memory_space<vmem>>, %arg5: memref<2x4xf32, #tpu.memory_space<vmem>>, %arg6: memref<1x8xf32, #tpu.memory_space<vmem>>, %arg7: memref<16x16xbf16, #tpu.memory_space<vmem>>) attributes {dimension_semantics = [#tpu.dimension_semantics<arbitrary>], iteration_bounds = array<i64: 1>, scalar_prefetch = 0 : i64, scratch_operands = 2 : i64, tpu.core_type = #tpu.core_type<tc>, window_params = [{transform_indices = @transform_0, window_bounds = array<i64: 16, 4>}, {transform_indices = @transform_1, window_bounds = array<i64: 16, 4>}, {transform_indices = @transform_2, window_bounds = array<i64: 16, 2>}, {pipeline_mode = #tpu.pipeline_mode<synchronous>, transform_indices = @transform_3, window_bounds = array<i64: 1, 4>}, {pipeline_mode = #tpu.pipeline_mode<synchronous>, transform_indices = @transform_4, window_bounds = array<i64: 2, 4>}]} {
    %c0_i32 = arith.constant 0 : i32
    %0 = arith.cmpi eq, %arg0, %c0_i32 : i32
    %1 = arith.extui %0 : i1 to i32
    %c0_i32_0 = arith.constant 0 : i32
    %2 = arith.cmpi ne, %1, %c0_i32_0 : i32
    scf.if %2 {
      %cst_36 = arith.constant 0.000000e+00 : f32
      %83 = vector.broadcast %cst_36 : f32 to vector<1x8xf32>
      %c0_37 = arith.constant 0 : index
      %c0_38 = arith.constant 0 : index
      %84 = vector.load %arg6[%c0_37, %c0_38] : memref<1x8xf32, #tpu.memory_space<vmem>>, vector<1x8xf32>
      tpu.vector_store %arg6[%c0_37, %c0_38], %83 {strides = array<i32>} : memref<1x8xf32, #tpu.memory_space<vmem>>, vector<1x8xf32>,
      %cst_39 = arith.constant 0.000000e+00 : f32
      %85 = vector.broadcast %cst_39 : f32 to vector<2x4xf32>
      %c0_40 = arith.constant 0 : index
      %c0_41 = arith.constant 0 : index
      %86 = vector.load %arg5[%c0_40, %c0_41] : memref<2x4xf32, #tpu.memory_space<vmem>>, vector<2x4xf32>
      tpu.vector_store %arg5[%c0_40, %c0_41], %85 {strides = array<i32>} : memref<2x4xf32, #tpu.memory_space<vmem>>, vector<2x4xf32>,
      %87 = tpu.iota {dimensions = array<i32: 0>} : vector<16x16xi32>
      %88 = tpu.iota {dimensions = array<i32: 1>} : vector<16x16xi32>
      %89 = arith.cmpi sle, %88, %87 : vector<16x16xi32>
      %90 = arith.extui %89 : vector<16x16xi1> to vector<16x16xi32>
      %91 = arith.sitofp %90 : vector<16x16xi32> to vector<16x16xf32>
      %92 = arith.truncf %91 : vector<16x16xf32> to vector<16x16xbf16>
      %c0_42 = arith.constant 0 : index
      %c0_43 = arith.constant 0 : index
      %93 = vector.load %arg7[%c0_42, %c0_43] : memref<16x16xbf16, #tpu.memory_space<vmem>>, vector<16x16xbf16>
      tpu.vector_store %arg7[%c0_42, %c0_43], %92 {strides = array<i32>} : memref<16x16xbf16, #tpu.memory_space<vmem>>, vector<16x16xbf16>,
    } else {
    }
    %c0 = arith.constant 0 : index
    %c0_1 = arith.constant 0 : index
    %3 = vector.load %arg1[%c0, %c0_1] : memref<16x4xf32, #tpu.memory_space<vmem>>, vector<16x4xf32>
    %cst = arith.constant dense<0xFF800000> : vector<16xf32>
    %4 = vector.multi_reduction <maximumf>, %3, %cst [1] : vector<16x4xf32> to vector<16xf32>
    %5 = vector.shape_cast %4 : vector<16xf32> to vector<16x1xf32>
    %6 = vector.broadcast %5 : vector<16x1xf32> to vector<16x4xf32>
    %7 = arith.subf %3, %6 : vector<16x4xf32>
    %8 = math.exp %7 : vector<16x4xf32>
    %cst_2 = arith.constant dense<0.000000e+00> : vector<16xf32>
    %9 = vector.multi_reduction <add>, %8, %cst_2 [1] : vector<16x4xf32> to vector<16xf32>
    %10 = vector.shape_cast %9 : vector<16xf32> to vector<16x1xf32>
    %11 = vector.broadcast %10 : vector<16x1xf32> to vector<16x4xf32>
    %12 = arith.divf %8, %11 : vector<16x4xf32>
    %13 = tpu.iota {dimensions = array<i32: 1>} : vector<16x4xi32>
    %cst_3 = arith.constant dense<0xFF800000> : vector<16xf32>
    %14 = vector.multi_reduction <maximumf>, %12, %cst_3 [1] : vector<16x4xf32> to vector<16xf32>
    %15 = vector.shape_cast %14 : vector<16xf32> to vector<16x1xf32>
    %16 = vector.broadcast %15 : vector<16x1xf32> to vector<16x4xf32>
    %17 = arith.cmpf oeq, %12, %16 : vector<16x4xf32>
    %c4_i32 = arith.constant 4 : i32
    %18 = vector.broadcast %c4_i32 : i32 to vector<16x4xi32>
    %19 = arith.select %17, %13, %18 : vector<16x4xi1>, vector<16x4xi32>
    %cst_4 = arith.constant dense<2147483647> : vector<16xi32>
    %20 = vector.multi_reduction <minsi>, %19, %cst_4 [1] : vector<16x4xi32> to vector<16xi32>
    %21 = vector.shape_cast %20 : vector<16xi32> to vector<16x1xi32>
    %22 = vector.broadcast %21 : vector<16x1xi32> to vector<16x4xi32>
    %23 = arith.cmpi eq, %13, %22 : vector<16x4xi32>
    %24 = arith.extui %23 : vector<16x4xi1> to vector<16x4xi32>
    %25 = arith.sitofp %24 : vector<16x4xi32> to vector<16x4xf32>
    %cst_5 = arith.constant 0.000000e+00 : f32
    %26 = vector.broadcast %cst_5 : f32 to vector<16x4xf32>
    %27 = arith.cmpf ogt, %25, %26 : vector<16x4xf32>
    %cst_6 = arith.constant 0xFF800000 : f32
    %28 = vector.broadcast %cst_6 : f32 to vector<16x4xf32>
    %29 = arith.select %27, %28, %12 : vector<16x4xi1>, vector<16x4xf32>
    %cst_7 = arith.constant dense<0xFF800000> : vector<16xf32>
    %30 = vector.multi_reduction <maximumf>, %29, %cst_7 [1] : vector<16x4xf32> to vector<16xf32>
    %31 = vector.shape_cast %30 : vector<16xf32> to vector<16x1xf32>
    %32 = vector.broadcast %31 : vector<16x1xf32> to vector<16x4xf32>
    %33 = arith.cmpf oeq, %29, %32 : vector<16x4xf32>
    %c4_i32_8 = arith.constant 4 : i32
    %34 = vector.broadcast %c4_i32_8 : i32 to vector<16x4xi32>
    %35 = arith.select %33, %13, %34 : vector<16x4xi1>, vector<16x4xi32>
    %cst_9 = arith.constant dense<2147483647> : vector<16xi32>
    %36 = vector.multi_reduction <minsi>, %35, %cst_9 [1] : vector<16x4xi32> to vector<16xi32>
    %37 = vector.shape_cast %36 : vector<16xi32> to vector<16x1xi32>
    %38 = vector.broadcast %37 : vector<16x1xi32> to vector<16x4xi32>
    %39 = arith.cmpi eq, %13, %38 : vector<16x4xi32>
    %40 = arith.extui %39 : vector<16x4xi1> to vector<16x4xi32>
    %41 = arith.sitofp %40 : vector<16x4xi32> to vector<16x4xf32>
    %c0_10 = arith.constant 0 : index
    %c0_11 = arith.constant 0 : index
    %42 = vector.load %arg5[%c0_10, %c0_11] : memref<2x4xf32, #tpu.memory_space<vmem>>, vector<1x4xf32>
    %cst_12 = arith.constant dense<0.000000e+00> : vector<4xf32>
    %43 = vector.multi_reduction <add>, %12, %cst_12 [0] : vector<16x4xf32> to vector<4xf32>
    %44 = vector.shape_cast %43 : vector<4xf32> to vector<1x4xf32>
    %45 = arith.addf %42, %44 : vector<1x4xf32>
    %c0_13 = arith.constant 0 : index
    %c0_14 = arith.constant 0 : index
    %46 = vector.load %arg5[%c0_13, %c0_14] : memref<2x4xf32, #tpu.memory_space<vmem>>, vector<1x4xf32>
    tpu.vector_store %arg5[%c0_13, %c0_14], %45 {strides = array<i32>} : memref<2x4xf32, #tpu.memory_space<vmem>>, vector<1x4xf32>,
    %c1 = arith.constant 1 : index
    %c0_15 = arith.constant 0 : index
    %47 = vector.load %arg5[%c1, %c0_15] : memref<2x4xf32, #tpu.memory_space<vmem>>, vector<1x4xf32>
    %48 = arith.addf %25, %41 : vector<16x4xf32>
    %cst_16 = arith.constant dense<0.000000e+00> : vector<4xf32>
    %49 = vector.multi_reduction <add>, %48, %cst_16 [0] : vector<16x4xf32> to vector<4xf32>
    %50 = vector.shape_cast %49 : vector<4xf32> to vector<1x4xf32>
    %51 = arith.addf %47, %50 : vector<1x4xf32>
    %c1_17 = arith.constant 1 : index
    %c0_18 = arith.constant 0 : index
    %52 = vector.load %arg5[%c1_17, %c0_18] : memref<2x4xf32, #tpu.memory_space<vmem>>, vector<1x4xf32>
    tpu.vector_store %arg5[%c1_17, %c0_18], %51 {strides = array<i32>} : memref<2x4xf32, #tpu.memory_space<vmem>>, vector<1x4xf32>,
    %53 = tpu.concatenate %25, %41 in 1 : vector<16x4xf32>, vector<16x4xf32> -> vector<16x8xf32>
    %54 = arith.truncf %53 : vector<16x8xf32> to vector<16x8xbf16>
    %c0_19 = arith.constant 0 : index
    %c0_20 = arith.constant 0 : index
    %55 = vector.load %arg6[%c0_19, %c0_20] : memref<1x8xf32, #tpu.memory_space<vmem>>, vector<1x8xf32>
    %c0_21 = arith.constant 0 : index
    %c0_22 = arith.constant 0 : index
    %56 = vector.load %arg7[%c0_21, %c0_22] : memref<16x16xbf16, #tpu.memory_space<vmem>>, vector<16x16xbf16>
    %cst_23 = arith.constant dense<0.000000e+00> : vector<16x8xf32>
    %57 = tpu.matmul %56, %54, %cst_23 {dimension_numbers = #tpu.dot_dimension_numbers<[1], [0], [0], [1], [0, 0, 1, 1], [], []>} : vector<16x16xbf16>, vector<16x8xbf16>, vector<16x8xf32> -> vector<16x8xf32>
    %58 = vector.broadcast %55 : vector<1x8xf32> to vector<16x8xf32>
    %59 = arith.addf %57, %58 : vector<16x8xf32>
    %60 = vector.extract_strided_slice %59 {offsets = [15, 0], sizes = [1, 8], strides = [1, 1]} : vector<16x8xf32> to vector<1x8xf32>
    %c0_24 = arith.constant 0 : index
    %c0_25 = arith.constant 0 : index
    %61 = vector.load %arg6[%c0_24, %c0_25] : memref<1x8xf32, #tpu.memory_space<vmem>>, vector<1x8xf32>
    tpu.vector_store %arg6[%c0_24, %c0_25], %60 {strides = array<i32>} : memref<1x8xf32, #tpu.memory_space<vmem>>, vector<1x8xf32>,
    %62 = vector.extract_strided_slice %59 {offsets = [0, 0], sizes = [16, 4], strides = [1, 1]} : vector<16x8xf32> to vector<16x4xf32>
    %cst_26 = arith.constant 1.000000e+00 : f32
    %63 = vector.broadcast %cst_26 : f32 to vector<16x4xf32>
    %64 = arith.subf %62, %63 : vector<16x4xf32>
    %65 = vector.extract_strided_slice %59 {offsets = [0, 4], sizes = [16, 4], strides = [1, 1]} : vector<16x8xf32> to vector<16x4xf32>
    %cst_27 = arith.constant 1.000000e+00 : f32
    %66 = vector.broadcast %cst_27 : f32 to vector<16x4xf32>
    %67 = arith.subf %65, %66 : vector<16x4xf32>
    %68 = arith.mulf %25, %64 : vector<16x4xf32>
    %cst_28 = arith.constant dense<0.000000e+00> : vector<16xf32>
    %69 = vector.multi_reduction <add>, %68, %cst_28 [1] : vector<16x4xf32> to vector<16xf32>
    %70 = vector.shape_cast %69 : vector<16xf32> to vector<16x1xf32>
    %71 = arith.mulf %41, %67 : vector<16x4xf32>
    %cst_29 = arith.constant dense<0.000000e+00> : vector<16xf32>
    %72 = vector.multi_reduction <add>, %71, %cst_29 [1] : vector<16x4xf32> to vector<16xf32>
    %73 = vector.shape_cast %72 : vector<16xf32> to vector<16x1xf32>
    %74 = arith.fptosi %70 : vector<16x1xf32> to vector<16x1xi32>
    %75 = arith.fptosi %73 : vector<16x1xf32> to vector<16x1xi32>
    %76 = tpu.concatenate %21, %37, %74, %75 in 1 : vector<16x1xi32>, vector<16x1xi32>, vector<16x1xi32>, vector<16x1xi32> -> vector<16x4xi32>
    %c0_30 = arith.constant 0 : index
    %c0_31 = arith.constant 0 : index
    %77 = vector.load %arg2[%c0_30, %c0_31] : memref<16x4xi32, #tpu.memory_space<vmem>>, vector<16x4xi32>
    tpu.vector_store %arg2[%c0_30, %c0_31], %76 {strides = array<i32>} : memref<16x4xi32, #tpu.memory_space<vmem>>, vector<16x4xi32>,
    %78 = tpu.concatenate %15, %31 in 1 : vector<16x1xf32>, vector<16x1xf32> -> vector<16x2xf32>
    %c0_32 = arith.constant 0 : index
    %c0_33 = arith.constant 0 : index
    %79 = vector.load %arg3[%c0_32, %c0_33] : memref<16x2xf32, #tpu.memory_space<vmem>>, vector<16x2xf32>
    tpu.vector_store %arg3[%c0_32, %c0_33], %78 {strides = array<i32>} : memref<16x2xf32, #tpu.memory_space<vmem>>, vector<16x2xf32>,
    %c0_i32_34 = arith.constant 0 : i32
    %80 = arith.cmpi eq, %arg0, %c0_i32_34 : i32
    %81 = arith.extui %80 : i1 to i32
    %c0_i32_35 = arith.constant 0 : i32
    %82 = arith.cmpi ne, %81, %c0_i32_35 : i32
    scf.if %82 {
      %83 = vector.extract_strided_slice %59 {offsets = [15, 0], sizes = [1, 4], strides = [1, 1]} : vector<16x8xf32> to vector<1x4xf32>
      %84 = arith.fptosi %83 : vector<1x4xf32> to vector<1x4xi32>
      %c0_36 = arith.constant 0 : index
      %c0_37 = arith.constant 0 : index
      %85 = vector.load %arg4[%c0_36, %c0_37] : memref<1x4xi32, #tpu.memory_space<vmem>>, vector<1x4xi32>
      tpu.vector_store %arg4[%c0_36, %c0_37], %84 {strides = array<i32>} : memref<1x4xi32, #tpu.memory_space<vmem>>, vector<1x4xi32>,
    } else {
    }
    return
  }
  func.func @transform_0(%arg0: i32) -> (i32, i32) {
    %c0_i32 = arith.constant 0 : i32
    %c0_i32_0 = arith.constant 0 : i32
    return %arg0, %c0_i32 : i32, i32
  }
  func.func @transform_1(%arg0: i32) -> (i32, i32) {
    %c0_i32 = arith.constant 0 : i32
    %c0_i32_0 = arith.constant 0 : i32
    return %arg0, %c0_i32 : i32, i32
  }
  func.func @transform_2(%arg0: i32) -> (i32, i32) {
    %c0_i32 = arith.constant 0 : i32
    %c0_i32_0 = arith.constant 0 : i32
    return %arg0, %c0_i32 : i32, i32
  }
  func.func @transform_3(%arg0: i32) -> (i32, i32) {
    %c0_i32 = arith.constant 0 : i32
    %c0_i32_0 = arith.constant 0 : i32
    %c0_i32_1 = arith.constant 0 : i32
    return %c0_i32, %c0_i32_0 : i32, i32
  }
  func.func @transform_4(%arg0: i32) -> (i32, i32) {
    %c0_i32 = arith.constant 0 : i32
    %c0_i32_0 = arith.constant 0 : i32
    %c0_i32_1 = arith.constant 0 : i32
    return %c0_i32, %c0_i32_0 : i32, i32
  }
}

</mosaic_0001>

<bundles_post_ra>
// kernel: tpu_custom_call.1
= control target key start
LH: loop header
LB: loop body
LE: loop exit
PB: predicated region body
PF: predicated region fallthrough
CT: control target
= control target key end

     0   :  { %10 = vsyncpa [#allocation5], 0  ;;  %vm41_vm0 = vcmask 31744   ;;  %s620_s0 = inlined_call_operand.vmem [shape: f32[16,4], index: 0, kind: input, shape index: {}]   ;;  %s621_s1 = inlined_call_operand.vmem [shape: s32[16,4], index: 1, kind: output, shape index: {0}]   ;;  %s622_s2 = inlined_call_operand.vmem [shape: f32[16,2], index: 2, kind: output, shape index: {1}]   ;;  %s623_s3 = inlined_call_operand.hbm [shape: s32[1,4], index: 3, kind: output, shape index: {2}]   ;;  %s624_s4 = inlined_call_operand.hbm [shape: f32[2,4], index: 4, kind: output, shape index: {3}]  }
   0x1   :  { %v39_v0 = vld [vmem:[%s620_s0] sm:$0xff] }
   0x2   :  { %11 = vsyncpa [#allocation7], 0  ;;  %v42_v1 = vsel %vm41_vm0, %v39_v0, -inf  ;;  %v40_v2 = vld [vmem:[%s620_s0 + $0x8] sm:$0xff]  ;;  %vm21_vm1 = vcmask 25600   ;;  %v458_v15 = vmov 0.0   ;;  %v23_v52 = vlaneseq }
   0x3   :  { %43 = vmax.xlane.f32.xlu0 %v42_v1  ;;  %v45_v3 = vsel %vm41_vm0, %v40_v2, -inf  ;;  %22 = vst.msk [vmem:[#allocation6] sm:$0x3] %vm21_vm1, %v458_v15  ;;  %vm199_vm10 = vcmask 24576   ;;  %s460_s22 = smov 124   ;;  %s461_s23 = smov [#allocation4]  }
   0x4   :  { %v513_v53 = vand.u32 127, %v23_v52  ;;  %s317_s24 = sshll.u32 %s461_s23, 4  ;;  %s319_s27 = sshll.u32 %s623_s3, 4  ;;  %s318_s24 = int_to_ptr.vmem [resolvable:$true] %s317_s24  ;;  %s320_s27 = int_to_ptr.hbm [resolvable:$true] %s319_s27 }
   0x5   :  { %s462_s28 = smov [#allocation6]   ;;  %s330_s6 = sshll.u32 %s624_s4, 4  ;;  %s331_s6 = int_to_ptr.hbm [resolvable:$true] %s330_s6 }
   0x6   :  { %s328_s29 = sshll.u32 %s462_s28, 4  ;;  %s329_s29 = int_to_ptr.vmem [resolvable:$true] %s328_s29 }
   0xa   :  { %v188_v49 = vld [vmem:[#allocation6] sm:$0x1] }
   0xb   :  { %46 = vmax.xlane.f32.xlu0 %v45_v3 }
  0x76   :  { %v44_v4 = vpop.xlane.xlu0 %43 }
  0x77   :  { %v48_v5 = vsub.f32 %v39_v0, %v44_v4 }
  0x79   :  { %v50_v6 = vmul.f32 1.442695, %v48_v5 }
  0x7b   :  { %398 = vpow2.f32 %v50_v6 }
  0x7e   :  { %v47_v7 = vpop.xlane.xlu0 %46 }
  0x7f   :  { %v49_v8 = vsub.f32 %v40_v2, %v47_v7 }
  0x81   :  { %v399_v9 = vpop.eup %398  ;;  %v52_v10 = vmul.f32 1.442695, %v49_v8 }
  0x82   :  { %v54_v11 = vsel %vm41_vm0, %v399_v9, 0.0 }
  0x83   :  { %400 = vpow2.f32 %v52_v10  ;;  %55 = vadd.xlane.f32.xlu1 %v54_v11 }
  0x89   :  { %v401_v12 = vpop.eup %400 }
  0x8a   :  { %v57_v13 = vsel %vm41_vm0, %v401_v12, 0.0 }
  0x8b   :  { %58 = vadd.xlane.f32.xlu1 %v57_v13 }
  0xf6   :  { %v56_v14 = vpop.xlane.xlu1 %55 }
  0xf7   :  { %402 = vrcp.f32 %v56_v14  ;;  %v71_v20 = vand.u32 2147483648, %v56_v14  ;;  %v69_v22 = vand.u32 2147483647, %v56_v14  ;;  %vm65_vm3 = vweird.f32 %v56_v14 }
  0xf9   :  { %v72_v25 = vor.u32 1.1754944e-38, %v71_v20  ;;  %vm70_vm5 = vcmp.eq.f32.partialorder %v69_v22, 8.507059e+37 }
  0xfd   :  { %v403_v16 = vpop.eup %402 }
  0xfe   :  { %v61_v17 = vmul.f32 %v403_v16, %v56_v14  ;;  %v59_v18 = vpop.xlane.xlu1 %58  ;;  %vm66_vm2 = vweird.f32 %v403_v16 }
  0xff   :  { %404 = vrcp.f32 %v59_v18  ;;  %vm67_vm4 = vmor %vm65_vm3, %vm66_vm2  ;;  %v86_v31 = vand.u32 2147483648, %v59_v18  ;;  %v84_v33 = vand.u32 2147483647, %v59_v18  ;;  %vm80_vm7 = vweird.f32 %v59_v18 }
 0x100   :  { %v62_v19 = vsub.f32 1.0, %v61_v17 }
 0x101   :  { %v87_v36 = vor.u32 1.1754944e-38, %v86_v31  ;;  %vm85_vm9 = vcmp.eq.f32.partialorder %v84_v33, 8.507059e+37 }
 0x102   :  { %v63_v21 = vmul.f32 %v403_v16, %v62_v19 }
 0x104   :  { %v64_v23 = vadd.f32 %v403_v16, %v63_v21 }
 0x105   :  { %v405_v24 = vpop.eup %404 }
 0x106   :  { %v76_v26 = vmul.f32 %v405_v24, %v59_v18  ;;  %v68_v27 = vsel %vm67_vm4, %v403_v16, %v64_v23  ;;  %vm81_vm6 = vweird.f32 %v405_v24  ;;  %vm287_vm4 = vcmask 7168  }
 0x107   :  { %v73_v28 = vsel %vm70_vm5, %v72_v25, %v68_v27  ;;  %vm82_vm8 = vmor %vm80_vm7, %vm81_vm6  ;;  %vm290_vm5 = vcmask 15360  }
 0x108   :  { %v77_v29 = vsub.f32 1.0, %v76_v26  ;;  %v499_v30 = vmul.f32 %v399_v9, %v73_v28 }
 0x10a   :  { %v78_v32 = vmul.f32 %v405_v24, %v77_v29  ;;  %v92_v34 = vsel %vm41_vm0, %v499_v30, -inf  ;;  %v189_v40 = vsel %vm41_vm0, %v499_v30, 0.0 }
 0x10b   :  { %93 = vmax.xlane.f32.xlu2 %v92_v34 }
 0x10c   :  { %v79_v35 = vadd.f32 %v405_v24, %v78_v32 }
 0x10e   :  { %v83_v37 = vsel %vm82_vm8, %v405_v24, %v79_v35 }
 0x10f   :  { %v88_v38 = vsel %vm85_vm9, %v87_v36, %v83_v37 }
 0x110   :  { %v503_v39 = vmul.f32 %v401_v12, %v88_v38 }
 0x112   :  { %v95_v41 = vsel %vm41_vm0, %v503_v39, -inf  ;;  %v190_v42 = vsel %vm41_vm0, %v503_v39, 0.0 }
 0x113   :  { %v191_v43 = vadd.f32 %v190_v42, %v189_v40  ;;  %96 = vmax.xlane.f32.xlu2 %v95_v41 }
 0x115   :  { %v192_v44 = vrot.slane %v191_v43, 4 }
 0x117   :  { %v193_v45 = vadd.f32 %v192_v44, %v191_v43 }
 0x119   :  { %v194_v46 = vrot.slane %v193_v45, 2 }
 0x11b   :  { %v195_v47 = vadd.f32 %v194_v46, %v193_v45 }
 0x11d   :  { %v196_v48 = vrot.slane %v195_v47, 1 }
 0x11f   :  { %v197_v50 = vadd.f32 %v196_v48, %v195_v47 }
 0x121   :  { %v198_v51 = vadd.f32 %v197_v50, %v188_v49 }
 0x123   :  { %200 = vst.msk [vmem:[#allocation6] sm:$0x1] %vm199_vm10, %v198_v51 }
 0x17e   :  { %v94_v54 = vpop.xlane.xlu2 %93 }
 0x17f   :  { %vm98_vm11 = vcmp.eq.f32.partialorder %v499_v30, %v94_v54 }
 0x180   :  { %v100_v55 = vsel %vm98_vm11, %v513_v53, 4 }
 0x181   :  { %v102_v56 = vsel %vm41_vm0, %v100_v55, 2147483647 }
 0x182   :  { %v104_v57 = vshra.s32 %v102_v56, 16  ;;  %v103_v0 = vand.u32 65535, %v102_v56 }
 0x184   :  { %v106_v58 = vcvt.s32.f32 %v104_v57  ;;  %v105_v2 = vcvt.s32.f32 %v103_v0 }
 0x186   :  { %v97_v59 = vpop.xlane.xlu2 %96  ;;  %107 = vmin.xlane.f32.xlu0 %v106_v58 }
 0x187   :  { %vm99_vm12 = vcmp.eq.f32.partialorder %v503_v39, %v97_v59 }
 0x188   :  { %v101_v60 = vsel %vm99_vm12, %v513_v53, 4 }
 0x189   :  { %v117_v61 = vsel %vm41_vm0, %v101_v60, 2147483647 }
 0x18a   :  { %v119_v62 = vshra.s32 %v117_v61, 16  ;;  %v118_v4 = vand.u32 65535, %v117_v61 }
 0x18c   :  { %v121_v63 = vcvt.s32.f32 %v119_v62  ;;  %v120_v6 = vcvt.s32.f32 %v118_v4 }
 0x18e   :  { %122 = vmin.xlane.f32.xlu1 %v121_v63 }
 0x1f9   :  { %v108_v1 = vpop.xlane.xlu0 %107 }
 0x1fa   :  { %vm109_vm13 = vcmp.eq.f32.partialorder %v106_v58, %v108_v1  ;;  %v114_v8 = vcvt.f32.s32 %v108_v1 }
 0x1fb   :  { %v110_v3 = vsel %vm109_vm13, %v105_v2, inf }
 0x1fc   :  { %111 = vmin.xlane.f32.xlu2 %v110_v3  ;;  %v115_v10 = vshll.u32 %v114_v8, 16 }
 0x201   :  { %v123_v5 = vpop.xlane.xlu1 %122 }
 0x202   :  { %vm124_vm14 = vcmp.eq.f32.partialorder %v121_v63, %v123_v5  ;;  %v129_v13 = vcvt.f32.s32 %v123_v5 }
 0x203   :  { %v125_v7 = vsel %vm124_vm14, %v120_v6, inf  ;;  %v201_v6 = vld [vmem:[#allocation6 + $0x1] sm:$0x1] }
 0x204   :  { %126 = vmin.xlane.f32.xlu0 %v125_v7  ;;  %v130_v18 = vshll.u32 %v129_v13, 16 }
 0x26f   :  { %v112_v9 = vpop.xlane.xlu2 %111 }
 0x270   :  { %v113_v11 = vcvt.f32.s32 %v112_v9  ;;  %v24_v9 = vshrl.u32 %v23_v52, 7 }
 0x272   :  { %v521_v12 = vadd.s32 %v115_v10, %v113_v11  ;;  %v25_v10 = vadd.s32 8, %v24_v9  ;;  %vm28_vm13 = vcmp.le.s32.totalorder %v513_v53, %v24_v9 }
 0x273   :  { %v348_v11 = vsel %vm28_vm13, 1.0, %v458_v15 }
 0x274   :  { %vm132_vm15 = vcmp.eq.s32.totalorder %v513_v53, %v521_v12  ;;  %vm29_vm14 = vcmp.le.s32.totalorder %v513_v53, %v25_v10 }
 0x275   :  { %v526_v14 = vsel %vm132_vm15, 1.0, %v458_v15  ;;  %v349_v13 = vsel %vm29_vm14, 1.0, %v458_v15  ;;  %vm36_vm15 = vcmask 125952  }
 0x276   :  { %vm138_vm1 = vcmp.gt.f32.partialorder %v526_v14, 0.0 }
 0x277   :  { %v127_v16 = vpop.xlane.xlu0 %126  ;;  %v140_v17 = vsel %vm138_vm1, -inf, %v499_v30  ;;  %vm19_vm1 = vcmask 57344  }
 0x278   :  { %v128_v19 = vcvt.f32.s32 %v127_v16  ;;  %v142_v20 = vsel %vm41_vm0, %v140_v17, -inf  ;;  %v34_v16 = vpack.c.bf16 %v348_v11, %v348_v11  ;;  %20 = vst.msk [vmem:[#allocation2] sm:$0x1] %vm19_vm1, %v458_v15 }
 0x279   :  { %143 = vmax.xlane.f32.xlu1 %v142_v20 }
 0x27a   :  { %v531_v21 = vadd.s32 %v130_v18, %v128_v19  ;;  %37 = vst.msk [vmem:[#allocation3] sm:$0xf] %vm36_vm15, %v34_v16 }
 0x27c   :  { %vm133_vm2 = vcmp.eq.s32.totalorder %v513_v53, %v531_v21 }
 0x27d   :  { %v536_v22 = vsel %vm133_vm2, 1.0, %v458_v15  ;;  %vm255_vm2 = vcmask 64519  }
 0x27e   :  { %vm139_vm3 = vcmp.gt.f32.partialorder %v536_v22, 0.0 }
 0x27f   :  { %v141_v23 = vsel %vm139_vm3, -inf, %v503_v39 }
 0x280   :  { %v145_v24 = vsel %vm41_vm0, %v141_v23, -inf }
 0x281   :  { %146 = vmax.xlane.f32.xlu2 %v145_v24 }
 0x2ec   :  { %v144_v25 = vpop.xlane.xlu1 %143 }
 0x2ed   :  { %vm148_vm6 = vcmp.eq.f32.partialorder %v140_v17, %v144_v25  ;;  %v298_v26 = vsel %vm287_vm4, %v94_v54, %v144_v25  ;;  %v35_v17 = vpack.c.bf16 %v349_v13, %v349_v13  ;;  %v397_v25 = vld [vmem:[#allocation2] ss:$0 sm:$0xff] }
 0x2ee   :  { %v150_v27 = vsel %vm148_vm6, %v513_v53, 4  ;;  %300 = vst.msk [vmem:[%s622_s2] sm:$0xff] %vm290_vm5, %v298_v26  ;;  %vm306_vm6 = vcmask 31751  }
 0x2ef   :  { %v152_v28 = vsel %vm41_vm0, %v150_v27, 2147483647  ;;  %38 = vst.msk [vmem:[#allocation3 + $0x4] sm:$0xf] %vm36_vm15, %v35_v17 }
 0x2f0   :  { %v154_v29 = vshra.s32 %v152_v28, 16  ;;  %v153_v37 = vand.u32 65535, %v152_v28 }
 0x2f2   :  { %v156_v30 = vcvt.s32.f32 %v154_v29  ;;  %v155_v39 = vcvt.s32.f32 %v153_v37 }
 0x2f4   :  { %v147_v31 = vpop.xlane.xlu2 %146  ;;  %157 = vmin.xlane.f32.xlu0 %v156_v30 }
 0x2f5   :  { %vm149_vm7 = vcmp.eq.f32.partialorder %v141_v23, %v147_v31  ;;  %v299_v32 = vsel %vm287_vm4, %v97_v59, %v147_v31 }
 0x2f6   :  { %v151_v33 = vsel %vm149_vm7, %v513_v53, 4  ;;  %301 = vst.msk [vmem:[%s622_s2 + $0x8] sm:$0xff] %vm290_vm5, %v299_v32  ;;  %s459_s2 = smov 4   ;;  %v361_v24 = vld [vmem:[#allocation3] sm:$0xff] }
 0x2f7   :  { %v167_v34 = vsel %vm41_vm0, %v151_v33, 2147483647 }
 0x2f8   :  { %v169_v35 = vshra.s32 %v167_v34, 16  ;;  %v168_v41 = vand.u32 65535, %v167_v34 }
 0x2fa   :  { %v171_v36 = vcvt.s32.f32 %v169_v35  ;;  %v170_v43 = vcvt.s32.f32 %v168_v41 }
 0x2fc   :  { %172 = vmin.xlane.f32.xlu1 %v171_v36 }
 0x367   :  { %v158_v38 = vpop.xlane.xlu0 %157 }
 0x368   :  { %vm159_vm8 = vcmp.eq.f32.partialorder %v156_v30, %v158_v38  ;;  %v164_v45 = vcvt.f32.s32 %v158_v38 }
 0x369   :  { %v160_v40 = vsel %vm159_vm8, %v155_v39, inf }
 0x36a   :  { %161 = vmin.xlane.f32.xlu2 %v160_v40  ;;  %v165_v47 = vshll.u32 %v164_v45, 16 }
 0x36f   :  { %v173_v42 = vpop.xlane.xlu1 %172 }
 0x370   :  { %vm174_vm9 = vcmp.eq.f32.partialorder %v171_v36, %v173_v42  ;;  %v179_v50 = vcvt.f32.s32 %v173_v42 }
 0x371   :  { %v175_v44 = vsel %vm174_vm9, %v170_v43, inf  ;;  %vm293_vm9 = vcmask 23552  }
 0x372   :  { %176 = vmin.xlane.f32.xlu0 %v175_v44  ;;  %v180_v54 = vshll.u32 %v179_v50, 16 }
 0x3dd   :  { %v162_v46 = vpop.xlane.xlu2 %161 }
 0x3de   :  { %v163_v48 = vcvt.f32.s32 %v162_v46 }
 0x3e0   :  { %v555_v49 = vadd.s32 %v165_v47, %v163_v48 }
 0x3e2   :  { %vm182_vm11 = vcmp.eq.s32.totalorder %v513_v53, %v555_v49 }
 0x3e3   :  { %v560_v56 = vsel %vm182_vm11, 1.0, %v458_v15 }
 0x3e4   :  { %v202_v58 = vadd.f32 %v560_v56, %v526_v14 }
 0x3e5   :  { %v177_v51 = vpop.xlane.xlu0 %176 }
 0x3e6   :  { %v178_v55 = vcvt.f32.s32 %v177_v51  ;;  %v204_v62 = vsel %vm41_vm0, %v202_v58, 0.0 }
 0x3e8   :  { %v562_v57 = vadd.s32 %v180_v54, %v178_v55  ;;  %v288_v55 = vsel %vm287_vm4, %v521_v12, %v555_v49 }
 0x3ea   :  { %vm183_vm12 = vcmp.eq.s32.totalorder %v513_v53, %v562_v57 }
 0x3eb   :  { %v569_v59 = vsel %vm183_vm12, 1.0, %v458_v15 }
 0x3ec   :  { %v203_v60 = vadd.f32 %v569_v59, %v536_v22  ;;  %v392_v61 = vpack.i.bf16 %v569_v59, %v560_v56 }
 0x3ee   :  { %v205_v63 = vsel %vm41_vm0, %v203_v60, 0.0  ;;  %393 = vrot.lane.b32.xlu1 %v392_v61, %s459_s2 }
 0x3ef   :  { %v206_v0 = vadd.f32 %v205_v63, %v204_v62 }
 0x3f1   :  { %v207_v1 = vrot.slane %v206_v0, 4 }
 0x3f3   :  { %v208_v2 = vadd.f32 %v207_v1, %v206_v0 }
 0x3f5   :  { %v209_v3 = vrot.slane %v208_v2, 2 }
 0x3f7   :  { %v210_v4 = vadd.f32 %v209_v3, %v208_v2  ;;  %v289_v3 = vsel %vm287_vm4, %v531_v21, %v562_v57 }
 0x3f9   :  { %v211_v5 = vrot.slane %v210_v4, 1 }
 0x3fb   :  { %v212_v7 = vadd.f32 %v211_v5, %v210_v4 }
 0x3fd   :  { %v213_v8 = vadd.f32 %v212_v7, %v201_v6 }
 0x3ff   :  { %214 = vst.msk [vmem:[#allocation6 + $0x1] sm:$0x1] %vm199_vm10, %v213_v8  ;;  %vm237_vm10 = vcmask 130048  }
 0x400   :  { %333 = dma.vmem_to_hbm [thread:$0]  %s329_s29, 32, %s331_s6, [#allocation7]  }
 0x460   :  { %v394_v18 = vpop.permute.xlu1 %393 }
 0x461   :  { %v396_v19 = vunpack.i.h.bf16 %v394_v18  ;;  %v395_v52 = vunpack.i.l.bf16 %v394_v18 }
 0x463   :  { %v223_v20 = vsel %vm41_vm0, %v526_v14, %v395_v52  ;;  %v224_v53 = vsel %vm41_vm0, %v536_v22, %v396_v19 }
 0x464   :  { %v225_v23 = vpack.c.bf16 %v224_v53, %v223_v20 }
 0x466   :  { %248 = vmatpush.bf16.msra.mxu0 %v225_v23 }
 0x469   :  { %358 = vmatmul.msk.bf16.vlgmr.msra.gmra.mxu0 %vm237_vm10, %v361_v24 }
 0x4e6   :  { %v250_v26 = vpop.f32.mrf.mxu0 }
 0x4e7   :  { %v251_v27 = vadd.f32 %v397_v25, %v250_v26 }
 0x4e9   :  { %v359_v28 = vadd.f32 -1.0, %v251_v27 }
 0x4eb   :  { %269 = vrot.lane.b32.xlu2 %v359_v28, %s460_s22  ;;  %v259_v37 = vmul.f32 %v359_v28, %v526_v14 }
 0x4ed   :  { %v261_v38 = vsel %vm41_vm0, %v259_v37, 0.0 }
 0x4ee   :  { %v252_v15 = vpop.f32.mrf.mxu0 }
 0x4ef   :  { %v253_v29 = vadd.f32 %v397_v25, %v252_v15 }
 0x4f1   :  { %256 = vst.msk [vmem:[#allocation2 - $0x7] sm:$0x80] %vm255_vm2, %v253_v29  ;;  %v360_v30 = vadd.f32 -1.0, %v253_v29  ;;  %vm382_vm3 = vcmp.lt.s32.totalorder %v253_v29, 0  ;;  %v383_v31 = vceil.f32 %v253_v29  ;;  %v384_v32 = vfloor.f32 %v253_v29 }
 0x4f3   :  { %271 = vrot.lane.b32.xlu0 %v360_v30, %s460_s22  ;;  %v260_v33 = vmul.f32 %v360_v30, %v536_v22  ;;  %v385_v34 = vsel %vm382_vm3, %v383_v31, %v384_v32 }
 0x4f4   :  { %v386_v35 = vcvt.f32.s32 %v385_v34 }
 0x4f5   :  { %v264_v36 = vsel %vm41_vm0, %v260_v33, 0.0 }
 0x4f6   :  { %265 = vadd.xlane.f32.xlu1 %v264_v36  ;;  %307 = vst.msk [vmem:[#allocation4 - $0x7] sm:$0x80] %vm306_vm6, %v386_v35 }
 0x4f7   :  { %322 = dma.vmem_to_hbm [thread:$0]  %s318_s24, 16, %s320_s27, [#allocation5]  }
 0x514   :  { %262 = vadd.xlane.f32.xlu2 %v261_v38 }
 0x545   :  { %v270_v39 = vpop.permute.xlu2 %269 }
 0x546   :  { %v275_v40 = vmul.f32 %v560_v56, %v270_v39 }
 0x548   :  { %v277_v41 = vsel %vm41_vm0, %v275_v40, 0.0 }
 0x549   :  { %278 = vadd.xlane.f32.xlu0 %v277_v41 }
 0x565   :  { %v272_v14 = vpop.permute.xlu0 %271 }
 0x566   :  { %v276_v22 = vmul.f32 %v569_v59, %v272_v14 }
 0x568   :  { %v280_v42 = vsel %vm41_vm0, %v276_v22, 0.0 }
 0x569   :  { %281 = vadd.xlane.f32.xlu2 %v280_v42  ;;  %v266_v60 = vpop.xlane.xlu1 %265 }
 0x56a   :  { %v368_v61 = vceil.f32 %v266_v60  ;;  %v369_v62 = vfloor.f32 %v266_v60  ;;  %vm367_vm11 = vcmp.lt.s32.totalorder %v266_v60, 0 }
 0x56c   :  { %v370_v63 = vsel %vm367_vm11, %v368_v61, %v369_v62 }
 0x56d   :  { %v371_v1 = vcvt.f32.s32 %v370_v63 }
 0x56f   :  { %v292_v5 = vsel %vm290_vm5, %v289_v3, %v371_v1 }
 0x587   :  { %v263_v43 = vpop.xlane.xlu2 %262 }
 0x588   :  { %v363_v44 = vceil.f32 %v263_v43  ;;  %v364_v45 = vfloor.f32 %v263_v43  ;;  %vm362_vm7 = vcmp.lt.s32.totalorder %v263_v43, 0 }
 0x58a   :  { %v365_v46 = vsel %vm362_vm7, %v363_v44, %v364_v45 }
 0x58b   :  { %v366_v48 = vcvt.f32.s32 %v365_v46 }
 0x58d   :  { %v291_v58 = vsel %vm290_vm5, %v288_v55, %v366_v48 }
 0x5bc   :  { %v279_v47 = vpop.xlane.xlu0 %278 }
 0x5bd   :  { %vm372_vm8 = vcmp.lt.s32.totalorder %v279_v47, 0  ;;  %v373_v50 = vceil.f32 %v279_v47  ;;  %v374_v51 = vfloor.f32 %v279_v47 }
 0x5bf   :  { %v375_v54 = vsel %vm372_vm8, %v373_v50, %v374_v51 }
 0x5c0   :  { %v376_v56 = vcvt.f32.s32 %v375_v54 }
 0x5c2   :  { %v294_v59 = vsel %vm293_vm9, %v291_v58, %v376_v56 }
 0x5c3   :  { %296 = vst.msk [vmem:[%s621_s1] sm:$0xff] %vm41_vm0, %v294_v59 }
 0x5dc   :  { %v282_v0 = vpop.xlane.xlu2 %281 }
 0x5dd   :  { %vm377_vm12 = vcmp.lt.s32.totalorder %v282_v0, 0  ;;  %v378_v2 = vceil.f32 %v282_v0  ;;  %v379_v12 = vfloor.f32 %v282_v0 }
 0x5df   :  { %v380_v49 = vsel %vm377_vm12, %v378_v2, %v379_v12 }
 0x5e0   :  { %v381_v4 = vcvt.f32.s32 %v380_v49 }
 0x5e2   :  { %v295_v6 = vsel %vm293_vm9, %v292_v5, %v381_v4 }
 0x5e3   :  { %297 = vst.msk [vmem:[%s621_s1 + $0x8] sm:$0xff] %vm41_vm0, %v295_v6 }
 0x5e4   :  { %454 = dma.done.wait [#allocation5], 16  }
 0x5e5   :  { %455 = vsyncadd [#allocation5], 4294967280 }
 0x5e6   :  { %456 = dma.done.wait [#allocation7], 32  }
 0x5e7   :  { %457 = vsyncadd [#allocation7], 4294967264 }
 0x5e8   :  { %346 = vsyncpa [#allocation5], 1 }
 0x5e9   :  { %347 = vsyncpa [#allocation7], 1 }

</bundles_post_ra>
